<compile_context>
chip_gen: v6e
topology: v6e:2x2x1
jax: 0.10.0
libtpu: 0.0.40
codegen_flags: <defaults>
</compile_context>

<pallas_src>
import jax
import jax.numpy as jnp
from jax.experimental import pallas as pl
from jax.experimental.pallas import tpu as pltpu

EPS = 1e-5
_WEIGHT_RESIDENT_BYTES = 16 * 1024 * 1024   # column-tile weights bigger than this


def _vmem_limit_bytes():
    try:
        cap = int(pltpu.get_tpu_info().vmem_capacity_bytes)
        return (cap * 3) // 4               # ~48 MiB on v7x, ~96 MiB on v5e/v6e
    except Exception:
        return 48 * 1024 * 1024             # conservative fallback (fits v7x)


def _pick_tile(dim, candidates):
    """Largest candidate tile that evenly divides `dim`, else the full dim."""
    for c in candidates:
        if c <= dim and dim % c == 0:
            return c
    return dim


def _layernorm(x, gamma, beta):
    mu = jnp.mean(x, axis=-1, keepdims=True)
    var = jnp.mean((x - mu) ** 2, axis=-1, keepdims=True)
    return (x - mu) * jax.lax.rsqrt(var + EPS) * gamma + beta


# ------------------- kernel A: LN1 + fused QKV projection -------------------
# grid = (S//tq, B, qkv-column-tiles); output is a single lane-dense store.
def ln_qkv_kernel(x_ref, g_ref, b_ref, w_ref, bias_ref, qkv_ref):
    x = x_ref[0]                                          # (tq, D) f32
    xn = _layernorm(x, g_ref[...], b_ref[...])            # f32 statistics
    acc = jnp.dot(xn.astype(w_ref.dtype), w_ref[...],     # bf16 operands, f32 acc
                  preferred_element_type=jnp.float32)
    qkv_ref[0] = (acc + bias_ref[...]).astype(qkv_ref.dtype)


# ------------------------ kernel B: flash attention -------------------------
# grid = (B, H, q-tiles, kv-tiles); kv axis is innermost "arbitrary".
def flash_attn_kernel(q_ref, k_ref, v_ref, o_ref, m_s, l_s, acc_s):
    j = pl.program_id(3)

    @pl.when(j == 0)
    def _init():
        m_s[...] = jnp.full(m_s.shape, -jnp.inf, jnp.float32)
        l_s[...] = jnp.zeros(l_s.shape, jnp.float32)
        acc_s[...] = jnp.zeros(acc_s.shape, jnp.float32)

    q = q_ref[0, 0]                                       # (tq, hd), scale pre-folded
    k = k_ref[0, 0]                                       # (tk, hd)
    v = v_ref[0, 0]                                       # (tk, hd)
    s = jnp.einsum("qd,kd->qk", q, k,
                   preferred_element_type=jnp.float32)    # (tq, tk) f32
    m_prev = m_s[...]
    m_new = jnp.maximum(m_prev, jnp.max(s, axis=-1, keepdims=True))
    alpha = jnp.exp(m_prev - m_new)
    p = jnp.exp(s - m_new)
    l_s[...] = alpha * l_s[...] + jnp.sum(p, axis=-1, keepdims=True)
    acc_s[...] = alpha * acc_s[...] + jnp.dot(
        p.astype(v.dtype), v, preferred_element_type=jnp.float32)
    m_s[...] = m_new

    # NOTE: no masking path here (module is unmasked full attention); the -inf
    # running max is safe because every row sees at least one finite score.
    @pl.when(j == pl.num_programs(3) - 1)
    def _finalize():
        inv_l = pl.reciprocal(l_s[...], approx=True)      # EUP reciprocal
        o_ref[0, 0] = (acc_s[...] * inv_l).astype(o_ref.dtype)


# ------------- kernel C1: out-projection + residual 1 + LN2 -----------------
# grid = (S//tq, B); single K=D matmul on the lane-merged attention output.
def out_ln2_kernel(x_ref, a_ref, wo_ref, bo_ref, g2_ref, b2_ref,
                   x1_ref, xn2_ref):
    proj = jnp.dot(a_ref[0], wo_ref[...], preferred_element_type=jnp.float32)
    x1 = x_ref[0] + proj + bo_ref[...]                    # residual 1 (f32)
    x1_ref[0] = x1.astype(x1_ref.dtype)
    xn2_ref[0] = _layernorm(x1, g2_ref[...], b2_ref[...]).astype(xn2_ref.dtype)


# -------------------- kernel C2: FFN (streamed) + residual 2 -----------------
# grid = (S//tq, B, dff//tf); the 4*D hidden dim is the innermost reduction.
def ffn_kernel(x1_ref, xn2_ref, w1_ref, b1_ref, w2_ref, b2_ref, o_ref, acc_ref):
    j = pl.program_id(2)

    @pl.when(j == 0)
    def _init():
        acc_ref[...] = jnp.zeros(acc_ref.shape, jnp.float32)

    h = jnp.dot(xn2_ref[0], w1_ref[...],
                preferred_element_type=jnp.float32) + b1_ref[...]
    h = jax.nn.gelu(h, approximate=False)                 # exact erf (nn.GELU())
    acc_ref[...] += jnp.dot(h.astype(w2_ref.dtype), w2_ref[...],
                            preferred_element_type=jnp.float32)

    @pl.when(j == pl.num_programs(2) - 1)
    def _finalize():
        o_ref[0] = (x1_ref[0] + acc_ref[...] + b2_ref[...]).astype(o_ref.dtype)


# --------------------------------- wrapper ----------------------------------
def transformer_block(x, params, heads, *, compute_dtype=jnp.bfloat16,
                      q_tile=None, kv_tile=None, ff_tile=None):
    (ln1_g, ln1_b, ln2_g, ln2_b,
     wqkv, bqkv, wout, bout, w1, bf1, w2, bf2) = params
    B, S, D = x.shape
    assert D % heads == 0
    hd = D // heads
    dff = w1.shape[1]
    csize = jnp.dtype(compute_dtype).itemsize

    vmem_limit = _vmem_limit_bytes()
    big_vmem = vmem_limit >= 80 * 1024 * 1024             # 128 MiB parts

    if q_tile is None:
        q_tile = _pick_tile(S, (512, 256, 128) if big_vmem else (256, 128))
    if kv_tile is None:
        kv_tile = _pick_tile(S, (1024, 512, 256, 128) if big_vmem
                             else (512, 256, 128))
    if ff_tile is None:
        ff_tile = _pick_tile(dff, (2048, 1536, 1024, 512, 256, 128) if big_vmem
                             else (1024, 768, 512, 256, 128))
    tq, tk, tf = min(q_tile, S), min(kv_tile, S), min(ff_tile, dff)
    assert S % tq == 0 and S % tk == 0 and dff % tf == 0, \
        "seq / ffn-hidden dims must be divisible by the chosen tile sizes"

    # Column-tile the QKV weight only when it is too big to sit in VMEM
    # comfortably (keeps v7x's 64 MiB happy without re-streaming small weights).
    if 3 * D * D * csize <= _WEIGHT_RESIDENT_BYTES:
        tn3 = 3 * D
    else:
        tn3 = _pick_tile(3 * D, (1536, 1152, 1024, 768, 512, 384, 256, 128))
    n3 = (3 * D) // tn3

    # Fold 1/sqrt(hd) into the q columns of wqkv/bqkv (removes a VALU op/tile).
    scale = 1.0 / (hd ** 0.5)
    col_scale = jnp.concatenate(
        [jnp.full((D,), scale, wqkv.dtype), jnp.ones((2 * D,), wqkv.dtype)])
    wqkv_c = (wqkv * col_scale).astype(compute_dtype)
    bqkv_f = (bqkv * col_scale).astype(jnp.float32)
    wout_c = wout.astype(compute_dtype)
    w1_c = w1.astype(compute_dtype)
    w2_c = w2.astype(compute_dtype)
    # TODO(synk): for very large D on v7x, column-tile wout (needs a separate
    # out-proj call since LN2 requires full rows); at D<=2048 it fits easily.

    def cparams(sem):
        return pltpu.CompilerParams(dimension_semantics=sem,
                                    vmem_limit_bytes=vmem_limit)

    # ---- A: LN1 + QKV projection (lane-dense merged qkv output) ----
    qkv = pl.pallas_call(
        ln_qkv_kernel,
        grid=(S // tq, B, n3),
        in_specs=[
            pl.BlockSpec((1, tq, D), lambda i, b, n: (b, i, 0)),   # x
            pl.BlockSpec((1, D), lambda i, b, n: (0, 0)),          # ln1 gamma
            pl.BlockSpec((1, D), lambda i, b, n: (0, 0)),          # ln1 beta
            pl.BlockSpec((D, tn3), lambda i, b, n: (0, n)),        # wqkv cols
            pl.BlockSpec((1, tn3), lambda i, b, n: (0, n)),        # bqkv cols
        ],
        out_specs=pl.BlockSpec((1, tq, tn3), lambda i, b, n: (b, i, n)),
        out_shape=jax.ShapeDtypeStruct((B, S, 3 * D), compute_dtype),
        compiler_params=cparams(("parallel", "parallel", "parallel")),
        cost_estimate=pl.CostEstimate(
            flops=2 * B * S * D * 3 * D,
            transcendentals=B * S,
            bytes_accessed=4 * B * S * D + csize * (3 * D * D + 3 * B * S * D)),
    )(x, ln1_g, ln1_b, wqkv_c, bqkv_f)

    # Head split is wrapper-side layout plumbing (XLA transpose, bf16 traffic).
    def split_heads(t):
        return t.reshape(B, S, heads, hd).transpose(0, 2, 1, 3)   # (B,H,S,hd)
    q, k, v = [split_heads(t) for t in jnp.split(qkv, 3, axis=-1)]

    # ---- B: flash attention ----
    # (On v5e, pipeline_mode=pl.Buffered(3) on the k/v specs can hide the
    #  per-step KV DMA behind the matmuls; default double-buffering kept here.)
    attn = pl.pallas_call(
        flash_attn_kernel,
        grid=(B, heads, S // tq, S // tk),
        in_specs=[
            pl.BlockSpec((1, 1, tq, hd), lambda b, h, i, j: (b, h, i, 0)),
            pl.BlockSpec((1, 1, tk, hd), lambda b, h, i, j: (b, h, j, 0)),
            pl.BlockSpec((1, 1, tk, hd), lambda b, h, i, j: (b, h, j, 0)),
        ],
        out_specs=pl.BlockSpec((1, 1, tq, hd), lambda b, h, i, j: (b, h, i, 0)),
        out_shape=jax.ShapeDtypeStruct((B, heads, S, hd), compute_dtype),
        scratch_shapes=[
            pltpu.VMEM((tq, 1), jnp.float32),      # running max
            pltpu.VMEM((tq, 1), jnp.float32),      # running sum
            pltpu.VMEM((tq, hd), jnp.float32),     # f32 accumulator
        ],
        compiler_params=cparams(("parallel", "parallel", "parallel", "arbitrary")),
        cost_estimate=pl.CostEstimate(
            flops=4 * B * S * S * D,
            transcendentals=B * heads * S * S,
            bytes_accessed=csize * (2 + 2 * (S // tq)) * B * S * D),
    )(q, k, v)

    # Head merge -> (B, S, D): lane-dense input for the single K=D out-proj.
    attn = attn.transpose(0, 2, 1, 3).reshape(B, S, D)

    # ---- C1: out-projection + residual 1 + LN2 (no pipeline bubble in FFN) ----
    x1, xn2 = pl.pallas_call(
        out_ln2_kernel,
        grid=(S // tq, B),
        in_specs=[
            pl.BlockSpec((1, tq, D), lambda i, b: (b, i, 0)),   # x
            pl.BlockSpec((1, tq, D), lambda i, b: (b, i, 0)),   # merged attn
            pl.BlockSpec((D, D), lambda i, b: (0, 0)),          # wout
            pl.BlockSpec((1, D), lambda i, b: (0, 0)),          # bout
            pl.BlockSpec((1, D), lambda i, b: (0, 0)),          # ln2 gamma
            pl.BlockSpec((1, D), lambda i, b: (0, 0)),          # ln2 beta
        ],
        out_specs=[pl.BlockSpec((1, tq, D), lambda i, b: (b, i, 0)),
                   pl.BlockSpec((1, tq, D), lambda i, b: (b, i, 0))],
        out_shape=[jax.ShapeDtypeStruct((B, S, D), jnp.float32),   # x1 residual
                   jax.ShapeDtypeStruct((B, S, D), compute_dtype)],  # LN2(x1)
        compiler_params=cparams(("parallel", "parallel")),
        cost_estimate=pl.CostEstimate(
            flops=2 * B * S * D * D,
            transcendentals=B * S,
            bytes_accessed=8 * B * S * D + csize * (2 * B * S * D + D * D)),
    )(x, attn, wout_c, bout, ln2_g, ln2_b)

    # ---- C2: FFN streamed over the 4*D hidden dim + residual 2 ----
    out = pl.pallas_call(
        ffn_kernel,
        grid=(S // tq, B, dff // tf),
        in_specs=[
            pl.BlockSpec((1, tq, D), lambda i, b, j: (b, i, 0)),   # x1
            pl.BlockSpec((1, tq, D), lambda i, b, j: (b, i, 0)),   # LN2(x1)
            pl.BlockSpec((D, tf), lambda i, b, j: (0, j)),         # w1 tile
            pl.BlockSpec((1, tf), lambda i, b, j: (0, j)),         # b1 tile
            pl.BlockSpec((tf, D), lambda i, b, j: (j, 0)),         # w2 tile
            pl.BlockSpec((1, D), lambda i, b, j: (0, 0)),          # b2
        ],
        out_specs=pl.BlockSpec((1, tq, D), lambda i, b, j: (b, i, 0)),
        out_shape=jax.ShapeDtypeStruct((B, S, D), x.dtype),
        scratch_shapes=[pltpu.VMEM((tq, D), jnp.float32)],         # FFN accumulator
        compiler_params=cparams(("parallel", "parallel", "arbitrary")),
        cost_estimate=pl.CostEstimate(
            flops=4 * B * S * D * dff,
            transcendentals=B * S * dff,
            bytes_accessed=(S // tq) * B * 2 * D * dff * csize
                           + (8 + csize) * B * S * D),
    )(x1, xn2, w1_c, bf1, w2_c, bf2)
    return out


# ---------------- pure-JAX reference (for correctness check) ----------------
def transformer_ref(x, params, heads):
    (ln1_g, ln1_b, ln2_g, ln2_b,
     wqkv, bqkv, wout, bout, w1, bf1, w2, bf2) = params
    B, S, D = x.shape
    hd = D // heads
    scale = 1.0 / (hd ** 0.5)

    def ln(v, g, b):
        mu = jnp.mean(v, axis=-1, keepdims=True)
        var = jnp.mean((v - mu) ** 2, axis=-1, keepdims=True)
        return (v - mu) * jax.lax.rsqrt(var + EPS) * g + b

    xn = ln(x, ln1_g, ln1_b)
    qkv = xn @ wqkv + bqkv
    q, k, v = jnp.split(qkv, 3, axis=-1)
    q = q.reshape(B, S, heads, hd).transpose(0, 2, 1, 3)
    k = k.reshape(B, S, heads, hd).transpose(0, 2, 1, 3)
    v = v.reshape(B, S, heads, hd).transpose(0, 2, 1, 3)
    s = jnp.einsum("bhqd,bhkd->bhqk", q, k) * scale
    p = jax.nn.softmax(s, axis=-1)
    a = jnp.einsum("bhqk,bhkd->bhqd", p, v).transpose(0, 2, 1, 3).reshape(B, S, D)
    x1 = x + (a @ wout + bout)
    xn2 = ln(x1, ln2_g, ln2_b)
    h = jax.nn.gelu(xn2 @ w1 + bf1, approximate=False)
    return x1 + (h @ w2 + bf2)


if __name__ == "__main__":
    # Small shapes consistent with the module (dim divisible by heads).
    B, S, D, H = 2, 8, 32, 4
    key = jax.random.PRNGKey(0)
    keys = jax.random.split(key, 8)

    x = jax.random.normal(keys[0], (B, S, D), dtype=jnp.float32)

    ln1_g = jnp.ones((1, D), jnp.float32)
    ln1_b = jnp.zeros((1, D), jnp.float32)
    ln2_g = jnp.ones((1, D), jnp.float32)
    ln2_b = jnp.zeros((1, D), jnp.float32)
    wqkv = jax.random.normal(keys[1], (D, 3 * D), jnp.float32) * 0.05
    bqkv = jax.random.normal(keys[2], (1, 3 * D), jnp.float32) * 0.01
    wout = jax.random.normal(keys[3], (D, D), jnp.float32) * 0.05
    bout = jax.random.normal(keys[4], (1, D), jnp.float32) * 0.01
    w1 = jax.random.normal(keys[5], (D, 4 * D), jnp.float32) * 0.05
    bf1 = jnp.zeros((1, 4 * D), jnp.float32)
    w2 = jax.random.normal(keys[6], (4 * D, D), jnp.float32) * 0.05
    bf2 = jnp.zeros((1, D), jnp.float32)

    params = (ln1_g, ln1_b, ln2_g, ln2_b,
              wqkv, bqkv, wout, bout, w1, bf1, w2, bf2)

    ref = transformer_ref(x, params, heads=H)

    # Default path: bf16 MXU operands, f32 accumulation / statistics.
    out_bf16 = jax.block_until_ready(transformer_block(x, params, heads=H))
    assert out_bf16.shape == (B, S, D)
    assert jnp.allclose(out_bf16, ref, atol=5e-2, rtol=5e-2), \
        "bf16 mismatch vs reference"

    # f32 path (tolerance accounts for the approximate EUP reciprocal in the
    # online-softmax normalisation).
    out_f32 = jax.block_until_ready(
        transformer_block(x, params, heads=H, compute_dtype=jnp.float32))
    assert jnp.allclose(out_f32, ref, atol=2e-3, rtol=2e-3), \
        "f32 mismatch vs reference"

    print("KERNEL_OK")
</pallas_src>

<mosaic_0001>
module attributes {stable_mosaic.version = 11 : i64} {
  func.func @ln_qkv_kernel(%arg0: i32, %arg1: i32, %arg2: i32, %arg3: memref<1x8x32xf32, #tpu.memory_space<vmem>>, %arg4: memref<1x32xf32, #tpu.memory_space<vmem>>, %arg5: memref<1x32xf32, #tpu.memory_space<vmem>>, %arg6: memref<32x96xbf16, #tpu.memory_space<vmem>>, %arg7: memref<1x96xf32, #tpu.memory_space<vmem>>, %arg8: memref<1x8x96xbf16, #tpu.memory_space<vmem>>) attributes {dimension_semantics = [#tpu.dimension_semantics<parallel>, #tpu.dimension_semantics<parallel>, #tpu.dimension_semantics<parallel>], iteration_bounds = array<i64: 1, 2, 1>, scalar_prefetch = 0 : i64, scratch_operands = 0 : i64, tpu.core_type = #tpu.core_type<tc>, window_params = [{transform_indices = @transform_0, window_bounds = array<i64: 1, 8, 32>}, {pipeline_mode = #tpu.pipeline_mode<synchronous>, transform_indices = @transform_1, window_bounds = array<i64: 1, 32>}, {pipeline_mode = #tpu.pipeline_mode<synchronous>, transform_indices = @transform_2, window_bounds = array<i64: 1, 32>}, {transform_indices = @transform_3, window_bounds = array<i64: 32, 96>}, {transform_indices = @transform_4, window_bounds = array<i64: 1, 96>}, {transform_indices = @transform_5, window_bounds = array<i64: 1, 8, 96>}]} {
    %c0 = arith.constant 0 : index
    %c0_0 = arith.constant 0 : index
    %c0_1 = arith.constant 0 : index
    %0 = vector.load %arg3[%c0, %c0_0, %c0_1] : memref<1x8x32xf32, #tpu.memory_space<vmem>>, vector<1x8x32xf32>
    %1 = vector.shape_cast %0 : vector<1x8x32xf32> to vector<8x32xf32>
    %c0_2 = arith.constant 0 : index
    %c0_3 = arith.constant 0 : index
    %2 = vector.load %arg4[%c0_2, %c0_3] : memref<1x32xf32, #tpu.memory_space<vmem>>, vector<1x32xf32>
    %c0_4 = arith.constant 0 : index
    %c0_5 = arith.constant 0 : index
    %3 = vector.load %arg5[%c0_4, %c0_5] : memref<1x32xf32, #tpu.memory_space<vmem>>, vector<1x32xf32>
    %cst = arith.constant dense<0.000000e+00> : vector<8xf32>
    %4 = vector.multi_reduction <add>, %1, %cst [1] : vector<8x32xf32> to vector<8xf32>
    %5 = vector.shape_cast %4 : vector<8xf32> to vector<8x1xf32>
    %cst_6 = arith.constant 3.200000e+01 : f32
    %6 = vector.broadcast %cst_6 : f32 to vector<8x1xf32>
    %7 = arith.divf %5, %6 : vector<8x1xf32>
    %8 = vector.broadcast %7 : vector<8x1xf32> to vector<8x32xf32>
    %9 = arith.subf %1, %8 : vector<8x32xf32>
    %10 = arith.mulf %9, %9 : vector<8x32xf32>
    %cst_7 = arith.constant dense<0.000000e+00> : vector<8xf32>
    %11 = vector.multi_reduction <add>, %10, %cst_7 [1] : vector<8x32xf32> to vector<8xf32>
    %12 = vector.shape_cast %11 : vector<8xf32> to vector<8x1xf32>
    %cst_8 = arith.constant 3.200000e+01 : f32
    %13 = vector.broadcast %cst_8 : f32 to vector<8x1xf32>
    %14 = arith.divf %12, %13 : vector<8x1xf32>
    %15 = vector.broadcast %7 : vector<8x1xf32> to vector<8x32xf32>
    %16 = arith.subf %1, %15 : vector<8x32xf32>
    %cst_9 = arith.constant 9.99999974E-6 : f32
    %17 = vector.broadcast %cst_9 : f32 to vector<8x1xf32>
    %18 = arith.addf %14, %17 : vector<8x1xf32>
    %19 = math.rsqrt %18 : vector<8x1xf32>
    %20 = vector.broadcast %19 : vector<8x1xf32> to vector<8x32xf32>
    %21 = arith.mulf %16, %20 : vector<8x32xf32>
    %22 = vector.broadcast %2 : vector<1x32xf32> to vector<8x32xf32>
    %23 = arith.mulf %21, %22 : vector<8x32xf32>
    %24 = vector.broadcast %3 : vector<1x32xf32> to vector<8x32xf32>
    %25 = arith.addf %23, %24 : vector<8x32xf32>
    %26 = arith.truncf %25 : vector<8x32xf32> to vector<8x32xbf16>
    %c0_10 = arith.constant 0 : index
    %c0_11 = arith.constant 0 : index
    %27 = vector.load %arg6[%c0_10, %c0_11] : memref<32x96xbf16, #tpu.memory_space<vmem>>, vector<32x96xbf16>
    %cst_12 = arith.constant dense<0.000000e+00> : vector<8x96xf32>
    %28 = tpu.matmul %26, %27, %cst_12 {dimension_numbers = #tpu.dot_dimension_numbers<[1], [0], [0], [1], [0, 0, 1, 1], [], []>} : vector<8x32xbf16>, vector<32x96xbf16>, vector<8x96xf32> -> vector<8x96xf32>
    %c0_13 = arith.constant 0 : index
    %c0_14 = arith.constant 0 : index
    %29 = vector.load %arg7[%c0_13, %c0_14] : memref<1x96xf32, #tpu.memory_space<vmem>>, vector<1x96xf32>
    %30 = vector.broadcast %29 : vector<1x96xf32> to vector<8x96xf32>
    %31 = arith.addf %28, %30 : vector<8x96xf32>
    %32 = arith.truncf %31 : vector<8x96xf32> to vector<8x96xbf16>
    %c0_15 = arith.constant 0 : index
    %c0_16 = arith.constant 0 : index
    %c0_17 = arith.constant 0 : index
    %33 = vector.load %arg8[%c0_15, %c0_16, %c0_17] : memref<1x8x96xbf16, #tpu.memory_space<vmem>>, vector<1x8x96xbf16>
    %34 = vector.shape_cast %33 : vector<1x8x96xbf16> to vector<8x96xbf16>
    %35 = vector.shape_cast %32 : vector<8x96xbf16> to vector<1x8x96xbf16>
    tpu.vector_store %arg8[%c0_15, %c0_16, %c0_17], %35 {strides = array<i32>} : memref<1x8x96xbf16, #tpu.memory_space<vmem>>, vector<1x8x96xbf16>,
    return
  }
  func.func @transform_0(%arg0: i32, %arg1: i32, %arg2: i32) -> (i32, i32, i32) {
    %c0_i32 = arith.constant 0 : i32
    %c0_i32_0 = arith.constant 0 : i32
    return %arg1, %arg0, %c0_i32 : i32, i32, i32
  }
  func.func @transform_1(%arg0: i32, %arg1: i32, %arg2: i32) -> (i32, i32) {
    %c0_i32 = arith.constant 0 : i32
    %c0_i32_0 = arith.constant 0 : i32
    %c0_i32_1 = arith.constant 0 : i32
    return %c0_i32, %c0_i32_0 : i32, i32
  }
  func.func @transform_2(%arg0: i32, %arg1: i32, %arg2: i32) -> (i32, i32) {
    %c0_i32 = arith.constant 0 : i32
    %c0_i32_0 = arith.constant 0 : i32
    %c0_i32_1 = arith.constant 0 : i32
    return %c0_i32, %c0_i32_0 : i32, i32
  }
  func.func @transform_3(%arg0: i32, %arg1: i32, %arg2: i32) -> (i32, i32) {
    %c0_i32 = arith.constant 0 : i32
    %c0_i32_0 = arith.constant 0 : i32
    return %c0_i32, %arg2 : i32, i32
  }
  func.func @transform_4(%arg0: i32, %arg1: i32, %arg2: i32) -> (i32, i32) {
    %c0_i32 = arith.constant 0 : i32
    %c0_i32_0 = arith.constant 0 : i32
    return %c0_i32, %arg2 : i32, i32
  }
  func.func @transform_5(%arg0: i32, %arg1: i32, %arg2: i32) -> (i32, i32, i32) {
    %c0_i32 = arith.constant 0 : i32
    return %arg1, %arg0, %arg2 : i32, i32, i32
  }
}

</mosaic_0001>

<bundles_post_ra>
// kernel: tpu_custom_call.1
= control target key start
LH: loop header
LB: loop body
LE: loop exit
PB: predicated region body
PF: predicated region fallthrough
CT: control target
= control target key end

     0   :  { %s1012_s0 = inlined_call_operand.hbm [shape: f32[2,8,32], index: 0, kind: input, shape index: {}]   ;;  %s1013_s1 = inlined_call_operand.vmem [shape: f32[1,32], index: 1, kind: input, shape index: {}]   ;;  %s1014_s2 = inlined_call_operand.vmem [shape: f32[1,32], index: 2, kind: input, shape index: {}]   ;;  %s1015_s3 = inlined_call_operand.hbm [shape: bf16[32,96], index: 3, kind: input, shape index: {}]   ;;  %s1016_s4 = inlined_call_operand.vmem [shape: f32[1,96], index: 4, kind: input, shape index: {}]   ;;  %s1017_s5 = inlined_call_operand.hbm [shape: bf16[2,8,96], index: 5, kind: output, shape index: {}]  }
   0x1   :  { %1020 = sst [smem:[#allocation12_spill]] %s1015_s3 }
   0x2   :  { %10 = vsyncpa [#allocation3], 0 }
   0x3   :  { %12 = vsyncpa [#allocation3 + $0x1], 0 }
   0x4   :  { %13 = vsyncpa [#allocation6], 0 }
   0x5   :  { %14 = vsyncpa [#allocation4], 0 }
   0x6   :  { %16 = vsyncpa [#allocation4 + $0x1], 0  ;;  %s820_s18 = smov 0   ;;  %s822_s19 = smov 0  }
   0x7   :  { %s824_s20 = smov 0   ;;  %s826_s21 = smov 0  }
   0x8   :  { %s828_s22 = smov 0   ;;  %s830_s23 = smov 0  }
   0x9 LB: > { %s529_s24 = sadd.s32 4294967295, %s781_s23   ;;  %s530_s25 = sadd.s32 4294967294, %s781_s23   ;;  %s781_s23 = sphi %s830_s23, %s22_s23   ;;  %s777_s22 = sphi %s828_s22, %s1040_s22   ;;  %s773_s21 = sphi %s826_s21, %s1039_s21   ;;  %s769_s20 = sphi %s824_s20, %s1038_s20   ;;  %s765_s19 = sphi %s822_s19, %s1037_s19   ;;  %s761_s18 = sphi %s820_s18, %s1036_s18  }
   0xa   : > { %p63_p0 = scmp.ne.s32.totalorder %s765_s19, %s761_s18  ;;  %p854_p1 = scmp.eq.s32.totalorder %s529_s24, 0 }
   0xb   : > { %p858_p2 = scmp.eq.s32.totalorder %s529_s24, 1  ;;  %p191_p3 = scmp.eq.s32.totalorder %s530_s25, 1 }
   0xc   : > { %p864_p4 = por %p854_p1, %p63_p0  ;;  %p531_p5 = scmp.ge.s32.totalorder %s781_s23, 1 }
   0xd   : > { %p869_p6 = por %p191_p3, %p63_p0  ;;  %p198_p7 = scmp.lt.s32.totalorder %s781_s23, 3 }
   0xe   : > { %s1023_s28 = scalar_select %p864_p4, 1, 0 }
   0xf   : > { %s1024_s29 = scalar_select %p869_p6, 1, 0 }
  0x10   : > { %p874_p8 = pnand %p531_p5, %p198_p7  ;;  %s783_s6 = smov [#allocation5]  }
  0x11   : > { %s218_s7 = sshll.u32 %s783_s6, 4  ;;  %s37_s9 = sadd.s32 1, %s777_s22  ;;  %s219_s7 = int_to_ptr.vmem [resolvable:$true] %s218_s7 }
  0x12   : > { %p570_p9 = pneg %p874_p8  ;;  %s654_s10 = scalar_lea.vmem %s219_s7, 256 }
  0x13   : > { %p655_p13 = scmp.ne.s32.totalorder %s219_s7, %s654_s10  ;;  %p662_p5 = scmp.lt.s32.totalorder %s219_s7, %s219_s7 }
  0x14   : > { %p883_p11 = pnand %p570_p9, %p854_p1  ;;  %p663_p7 = scmp.lt.s32.totalorder %s654_s10, %s654_s10 }
  0x16   : > { %p645_p12 = pneg %p883_p11  ;;  %p664_p6 = por %p663_p7, %p662_p5 }
  0x18   : > { %p657_p0 = pnand %p655_p13, %p645_p12 }
  0x1a   : > { %p658_p3 = pneg %p657_p0 }
  0x1c   : > { %p665_p4 = pnand %p664_p6, %p658_p3 }
  0x1e   : > { %668 = shalt.err (!%p665_p4)
}
  0x1f   : > { %s784_s11 = smov 64   ;;  %s785_s12 = smov 4  }
  0x20   : > { %s1027_s3 = sld [smem:[#allocation12_spill]]  ;;  %p39_p6 = scmp.ge.s32.totalorder %s37_s9, 2 }
  0x21   : > { %s50_s15 = sadd.s32 1, %s769_s20  ;;  %p57_p4 = scmp.ne.s32.totalorder %s769_s20, %s765_s19 }
  0x22   : > { %p58_p9 = scmp.eq.s32.totalorder %s781_s23, 0  ;;  %s1042_s9 = smov (%p39_p6, %s37_s9), 0 }
  0x23   : > { %1028 = sst [smem:[#allocation11_spill]] %s1042_s9  ;;  %p907_p13 = por %p858_p2, %p57_p4 }
  0x24   : > { %p901_p12 = por %p58_p9, %p57_p4  ;;  %s45_s24 = ssub.s32 %s777_s22, %s1042_s9 }
  0x25   : > { %p583_p0 = scmp.lt.s32.totalorder %s781_s23, 2  ;;  %s238_s25 = sand.u32 1, %s769_s20  }
  0x26   : > { %573 = dma.hbm_to_vmem [thread:$0]  (!%p883_p11), %s1027_s3, 256, %s219_s7, [#allocation6], %s784_s11, %s784_s11, %s785_s12  }
  0x27   : > { %p48_p11 = scmp.eq.s32.totalorder %s45_s24, 0  ;;  %s535_s6 = sshll.u32 %s238_s25, 3 }
  0x28   : > { %s536_s8 = sshll.u32 %s777_s22, 7  ;;  %s242_s13 = scalar_lea.vmem [#allocation2], %s535_s6 }
  0x29   : > { %s916_s7 = scalar_select %p48_p11, %s769_s20, %s50_s15  }
  0x2a   : > { %s248_s12 = scalar_lea.hbm %s1012_s0, %s536_s8  ;;  %s250_s14 = sshll.u32 %s242_s13, 4  ;;  %s251_s14 = int_to_ptr.vmem [resolvable:$true] %s250_s14 }
  0x2b   : > { %p924_p2 = pnand %p583_p0, %p901_p12  ;;  %s239_s3 = scalar_lea.sflag [#allocation3], %s238_s25 }
  0x2c   : > { %s682_s24 = scalar_lea.vmem %s251_s14, 128  ;;  %s786_s15 = smov [#allocation2]  }
  0x2d   : > { %p671_p3 = pneg %p924_p2  ;;  %p683_p5 = scmp.ne.s32.totalorder %s251_s14, %s682_s24 }
  0x2e   : > { %s687_s9 = sshll.u32 %s786_s15, 4  ;;  %s688_s9 = int_to_ptr.vmem [resolvable:$false] %s687_s9 }
  0x2f   : > { %p685_p7 = pnand %p683_p5, %p671_p3  ;;  %s689_s8 = scalar_lea.vmem %s688_s9, 256 }
  0x30   : > { %p690_p4 = scmp.lt.s32.totalorder %s251_s14, %s688_s9  ;;  %p691_p9 = scmp.lt.s32.totalorder %s689_s8, %s682_s24 }
  0x31   : > { %p686_p6 = pneg %p685_p7 }
  0x32   : > { %p692_p11 = por %p691_p9, %p690_p4 }
  0x34   : > { %p693_p10 = pnand %p692_p11, %p686_p6 }
  0x36   : > { %696 = shalt.err (!%p693_p10)
}
  0x37   : > { %577 = dma.hbm_to_vmem [thread:$0]  (!%p924_p2), %s248_s12, 128, %s251_s14, %s239_s3  }
  0x38   : > { %259 = sbr.rel (%p874_p8) target bundleno = 586 (0x24a), region = 40  ;;  %s935_s16 = sand.u32 (!%p874_p8), 1, %s765_s19  }
  0x39   : > { %s538_s25 = sshll.u32 (!%p874_p8), %s935_s16, 3  ;;  %s262_s6 = scalar_lea.sflag (!%p874_p8), [#allocation3], %s935_s16 }
  0x3a   : > { %s265_s10 = scalar_lea.vmem (!%p874_p8), [#allocation2], %s538_s25  ;;  %p1032_p12 = scmp.ne.s32.totalorder (!%p874_p8), %s1023_s28, 0 }
  0x3d   : > { %748 = dma.done.wait (%p1032_p12), %s262_s6, 128  }
  0x3e   : > { %750 = vsyncadd (%p1032_p12), %s262_s6, 4294967168 }
  0x3f   : > { %752 = dma.done.wait (%p854_p1), [#allocation6], 256  }
  0x40   : > { %754 = vsyncadd (%p854_p1), [#allocation6], 4294967040  ;;  %vm306_vm0 = vcmask 261120   ;;  %v303_v0 = vld [vmem:[%s265_s10] sm:$0xff]  ;;  %v639_v7 = vld [vmem:[#allocation5 + $0x8] sm:$0xff]   ;;  %v787_v8 = vmov 0.0  }
  0x41   : > { %v307_v1 = vsel %vm306_vm0, %v303_v0, 0.0  ;;  %554 = vmatprep.subr.bf16.mxu0 %v787_v8  ;;  %vm788_vm1 = vmmov 0   ;;  %v640_v9 = vld [vmem:[#allocation5] sm:$0xff]   ;;  %v541_v14 = vld [vmem:[%s1013_s1] ss:$0 sm:$0xff]  ;;  %s540_s9 = sshll.u32 %s935_s16, 2 }
  0x42   : > { %308 = vadd.xlane.f32.xlu0 %v307_v1  ;;  %558 = vmatprep.mubr.msk.bf16.mxu0 %vm788_vm1, %v787_v8  ;;  %v542_v16 = vld [vmem:[%s1014_s2] ss:$0 sm:$0xff]  ;;  %s548_s13 = sshll.u32 %s773_s21, 6  ;;  %s298_s14 = scalar_lea.vmem [#allocation7], %s540_s9  ;;  %vm403_vm2 = vcmask 781312  }
  0x43   : > { %555 = vmatpush3.bf16.msra.mxu0 %v639_v7  ;;  %v543_v20 = vld [vmem:[%s1016_s4] ss:$0 sm:$0xff]  ;;  %s421_s27 = sshll.u32 %s298_s14, 4  ;;  %s964_s8 = scalar_lea.hbm %s1017_s5, %s548_s13  ;;  %s966_s27 = int_to_ptr.vmem [resolvable:$true] %s421_s27 }
  0x44   : > { %556 = vmatprep.subr.bf16.mxu0 %v787_v8  ;;  %s406_s21 = scalar_lea.sflag [#allocation4], %s935_s16  ;;  %s697_s25 = scalar_lea.vmem %s966_s27, 64 }
  0x45   : > { %p698_p1 = scmp.ne.s32.totalorder %s966_s27, %s697_s25  ;;  %s789_s6 = smov [#allocation7]  }
  0x46   : > { %s701_s10 = sshll.u32 %s789_s6, 4  ;;  %s702_s10 = int_to_ptr.vmem [resolvable:$false] %s701_s10 }
  0x47   : > { %557 = vmatpush3.bf16.msra.mxu0 %v640_v9  ;;  %p699_p8 = pnand %p698_p1, %p907_p13  ;;  %s703_s3 = scalar_lea.vmem %s702_s10, 128 }
  0x48   : > { %p704_p0 = scmp.lt.s32.totalorder %s966_s27, %s702_s10  ;;  %p705_p2 = scmp.lt.s32.totalorder %s703_s3, %s697_s25 }
  0x49   : > { %p700_p10 = pneg %p699_p8 }
  0x4a   : > { %p706_p3 = por %p705_p2, %p704_p0 }
  0x4c   : > { %p707_p5 = pnand %p706_p3, %p700_p10 }
  0xcb   : > { %v309_v2 = vpop.xlane.xlu0 %308 }
  0xcc   : > { %v311_v3 = vmul.f32 0.03125, %v309_v2 }
  0xce   : > { %v312_v4 = vsub.f32 %v303_v0, %v311_v3 }
  0xd0   : > { %v313_v5 = vmul.f32 %v312_v4, %v312_v4 }
  0xd2   : > { %v314_v6 = vsel %vm306_vm0, %v313_v5, 0.0 }
  0xd3   : > { %315 = vadd.xlane.f32.xlu0 %v314_v6 }
 0x15c   : > { %v316_v10 = vpop.xlane.xlu0 %315 }
 0x15d   : > { %v317_v11 = vmul.f32 0.03125, %v316_v10 }
 0x15f   : > { %v318_v12 = vadd.f32 1e-05, %v317_v11 }
 0x161   : > { %641 = vrsqrt.f32 %v318_v12 }
 0x16e   : > { %v642_v13 = vpop.eup %641 }
 0x16f   : > { %v320_v15 = vmul.f32 %v642_v13, %v312_v4 }
 0x171   : > { %v327_v17 = vmul.f32 %v541_v14, %v320_v15 }
 0x173   : > { %v334_v18 = vadd.f32 %v542_v16, %v327_v17 }
 0x175   : > { %v335_v19 = vpack.c.bf16 %v334_v18, %v334_v18 }
 0x177   : > { %559 = vmatmul.mubr.msk.bf16.vlgmr.msra.gmra.mxu0 %vm306_vm0, %v335_v19 }
 0x237   : > { %v396_v21 = vpop.f32.mrf.mxu0 }
 0x238   : > { %v397_v22 = vadd.f32 %v543_v20, %v396_v21 }
 0x239   : > { %v560_v23 = vpop.f32.mrf.mxu0 }
 0x23a   : > { %v402_v24 = vpack.c.bf16 %v397_v22, %v397_v22 }
 0x23b   : > { %v399_v25 = vpop.f32.mrf.mxu0 }
 0x23c   : > { %404 = vst.msk [vmem:[%s298_s14] sm:$0xf] %vm403_vm2, %v402_v24 }
 0x23d   : > { %v561_v26 = vpop.f32.mrf.mxu0 }
 0x23e   : > { %710 = shalt.err (!%p707_p5)
}
 0x23f   : > { %s711_s26 = scalar_lea.hbm %s964_s8, 64  ;;  %s715_s30 = scalar_lea.hbm %s1017_s5, 128 }
 0x240   : > { %p712_p7 = scmp.ne.s32.totalorder %s964_s8, %s711_s26  ;;  %p716_p9 = scmp.lt.s32.totalorder %s964_s8, %s1017_s5 }
 0x241   : > { %p717_p11 = scmp.lt.s32.totalorder %s715_s30, %s711_s26 }
 0x242   : > { %p713_p6 = pnand %p712_p7, %p907_p13 }
 0x243   : > { %p718_p12 = por %p717_p11, %p716_p9 }
 0x244   : > { %p714_p4 = pneg %p713_p6 }
 0x246   : > { %p719_p1 = pnand %p718_p12, %p714_p4 }
 0x248   : > { %722 = shalt.err (!%p719_p1)
}
 0x249   : > { %568 = dma.vmem_to_hbm [thread:$0]  (%p907_p13), %s966_s27, 64, %s964_s8, %s406_s21  }
 0x24a PF: > { %s433_s12 = sand.u32 1, %s761_s18   ;;  %p1033_p8 = scmp.ne.s32.totalorder %s1024_s29, 0 }
 0x24b   : > { %p1034_p10 = scmp.ge.s32.totalorder %s781_s23, 2  ;;  %s434_s13 = scalar_lea.sflag [#allocation4], %s433_s12 }
 0x24d   : > { %p579_p0 = pnand %p1034_p10, %p1033_p8 }
 0x24f   : > { %p580_p2 = pneg %p579_p0 }
 0x251   : > { %756 = dma.done.wait (%p580_p2), %s434_s13, 64  }
 0x252   : > { %758 = vsyncadd (%p580_p2), %s434_s13, 4294967232  ;;  %s22_s23 = sadd.s32 1, %s781_s23   ;;  %s1035_s17 = sld [smem:[#allocation11_spill]] }
 0x253   : > { %p19_p3 = scmp.ge.s32.totalorder %s22_s23, 4   ;;  %s1036_s18 = smov %s765_s19 }
 0x254   : > { %s1037_s19 = smov %s769_s20  ;;  %s1038_s20 = smov %s916_s7 }
 0x255   : > { %s1039_s21 = smov %s777_s22  ;;  %21 = sbr.rel (!%p19_p3) target bundleno = 9 (0x9), region = 93 }
 0x258   : > { %s1040_s22 = smov %s1035_s17 }
 0x25a   :  { %439 = vsyncpa [#allocation3], 1 }
 0x25b   :  { %441 = vsyncpa [#allocation3 + $0x1], 1 }
 0x25c   :  { %442 = vsyncpa [#allocation6], 1 }
 0x25d   :  { %443 = vsyncpa [#allocation4], 1 }
 0x25e   :  { %445 = vsyncpa [#allocation4 + $0x1], 1 }

</bundles_post_ra>
